<compile_context>
chip_gen: v7x
topology: tpu7x:2x2x1
jax: 0.10.0
libtpu: 0.0.40
codegen_flags: <defaults>
</compile_context>

<pallas_src>
import jax
import jax.numpy as jnp
from jax.experimental import pallas as pl
from jax.experimental.pallas import tpu as pltpu

LANE = 128          # TPU lane width
B_TILE_MAX = 2048   # static default batch tile (review: 2048-4096 ~ roofline)


def _round_up(x, m):
    return (x + m - 1) // m * m


def _choose_tile(b):
    """Pick (b_tile, b_pad).  Small batches get a single exact tile; large
    batches get lane-aligned tiles capped at B_TILE_MAX with >= 2 grid steps
    so both v7x TensorCores receive work (no-op on single-TC v5e/v6e)."""
    b_pad = _round_up(max(b, 1), 8)
    if b_pad <= 256:
        return b_pad, b_pad
    half = _round_up((b_pad + 1) // 2, LANE)
    b_tile = min(B_TILE_MAX, half)
    b_pad = _round_up(b_pad, b_tile)
    return b_tile, b_pad


def bpr_kernel(u_ref, i_ref, j_ref, w1_ref, b1_ref, w2_ref, b2_ref, o_ref):
    # fc1 -> relu -> fc2 -> relu.  bf16 operands on the MXU, f32 accumulation,
    # f32 bias / ReLU / epilogue (keeps the VPU path f32, required on v5e).
    h = jnp.dot(u_ref[...], w1_ref[...],
                preferred_element_type=jnp.float32) + b1_ref[...]
    h = jnp.maximum(h, 0.0)
    h = jnp.dot(h.astype(jnp.bfloat16), w2_ref[...],
                preferred_element_type=jnp.float32) + b2_ref[...]
    h = jnp.maximum(h, 0.0)
    # Item streams arrive as bf16 (halves their HBM bytes); upcast to f32 so
    # the elementwise epilogue stays on the f32 VPU path.
    si = jnp.sum(h * i_ref[...].astype(jnp.float32), axis=1, keepdims=True)
    sj = jnp.sum(h * j_ref[...].astype(jnp.float32), axis=1, keepdims=True)
    # TODO(synk): lane-dense (2, B) output via an XLU transpose would remove
    # the 2-lane masked stores, but the output is only 8 B/row vs ~770 B/row
    # of input (<5% effect), so the proven (B, 2) store is kept.
    o_ref[...] = jnp.concatenate([si, sj], axis=1)


@jax.jit
def _bpr_forward(u_idx, i_idx, j_idx, user_tab, item_tab, w1t, b1, w2t, b2):
    """Gather (fused with lane-padding) + Pallas forward.  Returns two (B,)
    f32 score vectors.  All shape/tile decisions are static at trace time."""
    b = u_idx.shape[0]
    hd = user_tab.shape[1]       # true hidden_dim (e.g. 50)
    hp = w1t.shape[0]            # lane-padded hidden (e.g. 128)
    b_tile, b_pad = _choose_tile(b)

    if b_pad != b:
        # Padded slots index row 0 of the tables (always valid: the tables
        # have user_count+1 / item_count+1 rows); their scores are sliced off.
        pad = (0, b_pad - b)
        u_idx = jnp.pad(u_idx, pad)
        i_idx = jnp.pad(i_idx, pad)
        j_idx = jnp.pad(j_idx, pad)

    # Gather from the UNPADDED bf16 tables (table-side HBM reads are hd-wide),
    # then zero-extend the rows to the lane-aligned width.  XLA fuses the pad
    # into the gather, so no extra HBM pass is created by the padding.
    lane_pad = ((0, 0), (0, hp - hd))
    u_emb = jnp.pad(user_tab[u_idx], lane_pad)
    i_emb = jnp.pad(item_tab[i_idx], lane_pad)
    j_emb = jnp.pad(item_tab[j_idx], lane_pad)
    # TODO(synk): at much larger batch tiles / hidden_dim, move the gather into
    # the kernel (PrefetchScalarGridSpec(num_scalar_prefetch=3) + pl.ANY tables
    # + manual make_async_copy row gathers) to drop the gathered intermediate's
    # HBM write+read pass; at hd=50 / tiles<=2048 the per-row DMA-descriptor
    # issue cost exceeds the saved bandwidth, so the fused XLA gather is kept.

    grid = (b_pad // b_tile,)
    row_spec = pl.BlockSpec((b_tile, hp), lambda bq: (bq, 0))
    # Resident weights/biases (constant index_map).  At hp=128 the two bf16
    # weights are ~32 KiB each; for hp >= ~2048 they would blow v7x's 64 MiB
    # VMEM — add a weight-tiling (reduction-last, "arbitrary") grid axis first.
    # TODO(synk): weight-tiling grid axis before scaling hidden_dim.
    w_spec = pl.BlockSpec((hp, hp), lambda bq: (0, 0))
    bias_spec = pl.BlockSpec((1, hp), lambda bq: (0, 0))

    out = pl.pallas_call(
        bpr_kernel,
        out_shape=jax.ShapeDtypeStruct((b_pad, 2), jnp.float32),
        grid=grid,
        in_specs=[row_spec, row_spec, row_spec,
                  w_spec, bias_spec, w_spec, bias_spec],
        out_specs=pl.BlockSpec((b_tile, 2), lambda bq: (bq, 0)),
        compiler_params=pltpu.CompilerParams(
            dimension_semantics=("parallel",),      # shards tiles across v7x TCs
            vmem_limit_bytes=32 * 1024 * 1024,      # ~7 MB actual use at tile=2048
        ),
    )(u_emb, i_emb, j_emb, w1t, b1, w2t, b2)
    return out[:b, 0], out[:b, 1]


class RecommendationModelPallas:
    """JAX/Pallas port of the PyTorch RecommendationModel."""

    def __init__(self, user_count, item_count, hidden_dim, key):
        k0, k1, k2, k3, k4, k5 = jax.random.split(key, 6)
        self.hidden_dim = hidden_dim

        # f32 master parameters (torch-equivalent init).
        # torch.rand -> U[0, 1)
        self.user_emb_w = jax.random.uniform(
            k0, (user_count + 1, hidden_dim), dtype=jnp.float32)
        self.item_emb_w = jax.random.uniform(
            k1, (item_count + 1, hidden_dim), dtype=jnp.float32)
        # torch.nn.Linear default init: U(-1/sqrt(fan_in), 1/sqrt(fan_in))
        bound = 1.0 / jnp.sqrt(jnp.float32(hidden_dim))
        self.fc1_w = jax.random.uniform(
            k2, (hidden_dim, hidden_dim), jnp.float32, -bound, bound)
        self.fc1_b = jax.random.uniform(
            k3, (hidden_dim,), jnp.float32, -bound, bound)
        self.fc2_w = jax.random.uniform(
            k4, (hidden_dim, hidden_dim), jnp.float32, -bound, bound)
        self.fc2_b = jax.random.uniform(
            k5, (hidden_dim,), jnp.float32, -bound, bound)

        # ---- Precomputed kernel-side operands (built ONCE, not per call) ----
        hp = _round_up(hidden_dim, LANE)
        self._hp = hp
        pad_both = ((0, hp - hidden_dim), (0, hp - hidden_dim))
        # Tables kept UNPADDED in HBM (gather reads only hd-wide rows) and in
        # bf16 (streamed bytes halved).  Note: if a downstream BPR loss is
        # sensitive to si - sj cancellation, keep the user table f32 instead.
        self._user_tab = self.user_emb_w.astype(jnp.bfloat16)
        self._item_tab = self.item_emb_w.astype(jnp.bfloat16)
        # Pre-transposed, zero-padded bf16 weights; f32 (1, Hp) biases.
        self._w1t = jnp.pad(self.fc1_w.T, pad_both).astype(jnp.bfloat16)
        self._w2t = jnp.pad(self.fc2_w.T, pad_both).astype(jnp.bfloat16)
        self._b1 = jnp.pad(self.fc1_b, (0, hp - hidden_dim)).reshape(1, hp)
        self._b2 = jnp.pad(self.fc2_b, (0, hp - hidden_dim)).reshape(1, hp)

    def __call__(self, u, i, j):
        return _bpr_forward(jnp.asarray(u, jnp.int32),
                            jnp.asarray(i, jnp.int32),
                            jnp.asarray(j, jnp.int32),
                            self._user_tab, self._item_tab,
                            self._w1t, self._b1, self._w2t, self._b2)


def _reference_f32(model, u, i, j):
    """Pure-f32 JAX reference matching the torch forward exactly."""
    u_emb = model.user_emb_w[u]
    i_emb = model.item_emb_w[i]
    j_emb = model.item_emb_w[j]
    h = jnp.maximum(u_emb @ model.fc1_w.T + model.fc1_b, 0.0)
    h = jnp.maximum(h @ model.fc2_w.T + model.fc2_b, 0.0)
    return jnp.sum(h * i_emb, axis=1), jnp.sum(h * j_emb, axis=1)


def _reference_bf16(model, u, i, j):
    """Reference mirroring the kernel numerics (bf16 operands, f32 acc)."""
    u_emb = model.user_emb_w[u].astype(jnp.bfloat16)
    i_emb = model.item_emb_w[i].astype(jnp.bfloat16).astype(jnp.float32)
    j_emb = model.item_emb_w[j].astype(jnp.bfloat16).astype(jnp.float32)
    w1t = model.fc1_w.T.astype(jnp.bfloat16)
    w2t = model.fc2_w.T.astype(jnp.bfloat16)
    h = jnp.maximum(
        jnp.dot(u_emb, w1t, preferred_element_type=jnp.float32) + model.fc1_b, 0.0)
    h = jnp.maximum(
        jnp.dot(h.astype(jnp.bfloat16), w2t,
                preferred_element_type=jnp.float32) + model.fc2_b, 0.0)
    return jnp.sum(h * i_emb, axis=1), jnp.sum(h * j_emb, axis=1)


if __name__ == "__main__":
    user_count, item_count, hidden_dim, batch = 10, 20, 50, 16

    key = jax.random.PRNGKey(0)
    kmodel, ku, ki, kj = jax.random.split(key, 4)

    model = RecommendationModelPallas(user_count, item_count, hidden_dim, kmodel)

    u = jax.random.randint(ku, (batch,), 0, user_count + 1, dtype=jnp.int32)
    i = jax.random.randint(ki, (batch,), 0, item_count + 1, dtype=jnp.int32)
    j = jax.random.randint(kj, (batch,), 0, item_count + 1, dtype=jnp.int32)

    scores_i, scores_j = model(u, i, j)
    jax.block_until_ready((scores_i, scores_j))

    ref_bi, ref_bj = _reference_bf16(model, u, i, j)
    ref_fi, ref_fj = _reference_f32(model, u, i, j)

    assert scores_i.shape == (batch,) and scores_j.shape == (batch,)
    # Tight check vs the bf16-mimicking reference (same numerics as the kernel).
    assert jnp.allclose(scores_i, ref_bi, atol=1e-2, rtol=1e-2)
    assert jnp.allclose(scores_j, ref_bj, atol=1e-2, rtol=1e-2)
    # Looser sanity check vs the exact f32 torch-equivalent forward.
    assert jnp.allclose(scores_i, ref_fi, atol=1e-1, rtol=5e-2)
    assert jnp.allclose(scores_j, ref_fj, atol=1e-1, rtol=5e-2)

    print("KERNEL_OK")
</pallas_src>

<mosaic_0001>
module attributes {stable_mosaic.version = 11 : i64} {
  func.func @bpr_kernel(%arg0: i32, %arg1: memref<16x128xbf16, #tpu.memory_space<vmem>>, %arg2: memref<16x128xbf16, #tpu.memory_space<vmem>>, %arg3: memref<16x128xbf16, #tpu.memory_space<vmem>>, %arg4: memref<128x128xbf16, #tpu.memory_space<vmem>>, %arg5: memref<1x128xf32, #tpu.memory_space<vmem>>, %arg6: memref<128x128xbf16, #tpu.memory_space<vmem>>, %arg7: memref<1x128xf32, #tpu.memory_space<vmem>>, %arg8: memref<16x2xf32, #tpu.memory_space<vmem>>) attributes {dimension_semantics = [#tpu.dimension_semantics<parallel>], iteration_bounds = array<i64: 1>, scalar_prefetch = 0 : i64, scratch_operands = 0 : i64, tpu.core_type = #tpu.core_type<tc>, window_params = [{transform_indices = @transform_0, window_bounds = array<i64: 16, 128>}, {transform_indices = @transform_1, window_bounds = array<i64: 16, 128>}, {transform_indices = @transform_2, window_bounds = array<i64: 16, 128>}, {pipeline_mode = #tpu.pipeline_mode<synchronous>, transform_indices = @transform_3, window_bounds = array<i64: 128, 128>}, {pipeline_mode = #tpu.pipeline_mode<synchronous>, transform_indices = @transform_4, window_bounds = array<i64: 1, 128>}, {pipeline_mode = #tpu.pipeline_mode<synchronous>, transform_indices = @transform_5, window_bounds = array<i64: 128, 128>}, {pipeline_mode = #tpu.pipeline_mode<synchronous>, transform_indices = @transform_6, window_bounds = array<i64: 1, 128>}, {transform_indices = @transform_7, window_bounds = array<i64: 16, 2>}]} {
    %c0 = arith.constant 0 : index
    %c0_0 = arith.constant 0 : index
    %0 = vector.load %arg1[%c0, %c0_0] : memref<16x128xbf16, #tpu.memory_space<vmem>>, vector<16x128xbf16>
    %c0_1 = arith.constant 0 : index
    %c0_2 = arith.constant 0 : index
    %1 = vector.load %arg4[%c0_1, %c0_2] : memref<128x128xbf16, #tpu.memory_space<vmem>>, vector<128x128xbf16>
    %cst = arith.constant dense<0.000000e+00> : vector<16x128xf32>
    %2 = tpu.matmul %0, %1, %cst {dimension_numbers = #tpu.dot_dimension_numbers<[1], [0], [0], [1], [0, 0, 1, 1], [], []>} : vector<16x128xbf16>, vector<128x128xbf16>, vector<16x128xf32> -> vector<16x128xf32>
    %c0_3 = arith.constant 0 : index
    %c0_4 = arith.constant 0 : index
    %3 = vector.load %arg5[%c0_3, %c0_4] : memref<1x128xf32, #tpu.memory_space<vmem>>, vector<1x128xf32>
    %4 = vector.broadcast %3 : vector<1x128xf32> to vector<16x128xf32>
    %5 = arith.addf %2, %4 : vector<16x128xf32>
    %cst_5 = arith.constant 0.000000e+00 : f32
    %6 = vector.broadcast %cst_5 : f32 to vector<16x128xf32>
    %7 = arith.maximumf %5, %6 : vector<16x128xf32>
    %8 = arith.truncf %7 : vector<16x128xf32> to vector<16x128xbf16>
    %c0_6 = arith.constant 0 : index
    %c0_7 = arith.constant 0 : index
    %9 = vector.load %arg6[%c0_6, %c0_7] : memref<128x128xbf16, #tpu.memory_space<vmem>>, vector<128x128xbf16>
    %cst_8 = arith.constant dense<0.000000e+00> : vector<16x128xf32>
    %10 = tpu.matmul %8, %9, %cst_8 {dimension_numbers = #tpu.dot_dimension_numbers<[1], [0], [0], [1], [0, 0, 1, 1], [], []>} : vector<16x128xbf16>, vector<128x128xbf16>, vector<16x128xf32> -> vector<16x128xf32>
    %c0_9 = arith.constant 0 : index
    %c0_10 = arith.constant 0 : index
    %11 = vector.load %arg7[%c0_9, %c0_10] : memref<1x128xf32, #tpu.memory_space<vmem>>, vector<1x128xf32>
    %12 = vector.broadcast %11 : vector<1x128xf32> to vector<16x128xf32>
    %13 = arith.addf %10, %12 : vector<16x128xf32>
    %cst_11 = arith.constant 0.000000e+00 : f32
    %14 = vector.broadcast %cst_11 : f32 to vector<16x128xf32>
    %15 = arith.maximumf %13, %14 : vector<16x128xf32>
    %c0_12 = arith.constant 0 : index
    %c0_13 = arith.constant 0 : index
    %16 = vector.load %arg2[%c0_12, %c0_13] : memref<16x128xbf16, #tpu.memory_space<vmem>>, vector<16x128xbf16>
    %17 = arith.extf %16 : vector<16x128xbf16> to vector<16x128xf32>
    %18 = arith.mulf %15, %17 : vector<16x128xf32>
    %cst_14 = arith.constant dense<0.000000e+00> : vector<16xf32>
    %19 = vector.multi_reduction <add>, %18, %cst_14 [1] : vector<16x128xf32> to vector<16xf32>
    %20 = vector.shape_cast %19 : vector<16xf32> to vector<16x1xf32>
    %c0_15 = arith.constant 0 : index
    %c0_16 = arith.constant 0 : index
    %21 = vector.load %arg3[%c0_15, %c0_16] : memref<16x128xbf16, #tpu.memory_space<vmem>>, vector<16x128xbf16>
    %22 = arith.extf %21 : vector<16x128xbf16> to vector<16x128xf32>
    %23 = arith.mulf %15, %22 : vector<16x128xf32>
    %cst_17 = arith.constant dense<0.000000e+00> : vector<16xf32>
    %24 = vector.multi_reduction <add>, %23, %cst_17 [1] : vector<16x128xf32> to vector<16xf32>
    %25 = vector.shape_cast %24 : vector<16xf32> to vector<16x1xf32>
    %26 = tpu.concatenate %20, %25 in 1 : vector<16x1xf32>, vector<16x1xf32> -> vector<16x2xf32>
    %c0_18 = arith.constant 0 : index
    %c0_19 = arith.constant 0 : index
    %27 = vector.load %arg8[%c0_18, %c0_19] : memref<16x2xf32, #tpu.memory_space<vmem>>, vector<16x2xf32>
    tpu.vector_store %arg8[%c0_18, %c0_19], %26 {strides = array<i32>} : memref<16x2xf32, #tpu.memory_space<vmem>>, vector<16x2xf32>,
    return
  }
  func.func @transform_0(%arg0: i32) -> (i32, i32) {
    %c0_i32 = arith.constant 0 : i32
    %c0_i32_0 = arith.constant 0 : i32
    return %arg0, %c0_i32 : i32, i32
  }
  func.func @transform_1(%arg0: i32) -> (i32, i32) {
    %c0_i32 = arith.constant 0 : i32
    %c0_i32_0 = arith.constant 0 : i32
    return %arg0, %c0_i32 : i32, i32
  }
  func.func @transform_2(%arg0: i32) -> (i32, i32) {
    %c0_i32 = arith.constant 0 : i32
    %c0_i32_0 = arith.constant 0 : i32
    return %arg0, %c0_i32 : i32, i32
  }
  func.func @transform_3(%arg0: i32) -> (i32, i32) {
    %c0_i32 = arith.constant 0 : i32
    %c0_i32_0 = arith.constant 0 : i32
    %c0_i32_1 = arith.constant 0 : i32
    return %c0_i32, %c0_i32_0 : i32, i32
  }
  func.func @transform_4(%arg0: i32) -> (i32, i32) {
    %c0_i32 = arith.constant 0 : i32
    %c0_i32_0 = arith.constant 0 : i32
    %c0_i32_1 = arith.constant 0 : i32
    return %c0_i32, %c0_i32_0 : i32, i32
  }
  func.func @transform_5(%arg0: i32) -> (i32, i32) {
    %c0_i32 = arith.constant 0 : i32
    %c0_i32_0 = arith.constant 0 : i32
    %c0_i32_1 = arith.constant 0 : i32
    return %c0_i32, %c0_i32_0 : i32, i32
  }
  func.func @transform_6(%arg0: i32) -> (i32, i32) {
    %c0_i32 = arith.constant 0 : i32
    %c0_i32_0 = arith.constant 0 : i32
    %c0_i32_1 = arith.constant 0 : i32
    return %c0_i32, %c0_i32_0 : i32, i32
  }
  func.func @transform_7(%arg0: i32) -> (i32, i32) {
    %c0_i32 = arith.constant 0 : i32
    %c0_i32_0 = arith.constant 0 : i32
    return %arg0, %c0_i32 : i32, i32
  }
}

</mosaic_0001>

<bundles_post_ra>
// kernel: _bpr_forward.1
= control target key start
LH: loop header
LB: loop body
LE: loop exit
PB: predicated region body
PF: predicated region fallthrough
CT: control target
= control target key end

     0   :  { %v398_v0 = vmov 0.0   ;;  %vm399_vm0 = vmmov 0   ;;  %vm284_vm1 = vcmask 7168   ;;  %vm287_vm2 = vcmask 15360   ;;  %s509_s3 = inlined_call_operand.vmem [shape: bf16[128,128], index: 3, kind: input, shape index: {}]   ;;  %s510_s5 = inlined_call_operand.vmem [shape: bf16[128,128], index: 5, kind: input, shape index: {}]   ;;  %s511_s0 = inlined_call_operand.vmem [shape: bf16[16,128], index: 0, kind: input, shape index: {}]   ;;  %s512_s4 = inlined_call_operand.vmem [shape: f32[1,128], index: 4, kind: input, shape index: {}]   ;;  %s513_s6 = inlined_call_operand.vmem [shape: f32[1,128], index: 6, kind: input, shape index: {}]   ;;  %s514_s2 = inlined_call_operand.vmem [shape: bf16[16,128], index: 2, kind: input, shape index: {}]   ;;  %s515_s1 = inlined_call_operand.vmem [shape: bf16[16,128], index: 1, kind: input, shape index: {}]   ;;  %s516_s7 = inlined_call_operand.vmem [shape: f32[16,2], index: 7, kind: output, shape index: {}]  }
   0x1   :  { %339 = vmatprep.subr.bf16.mxu0 %v398_v0  ;;  %v381_v1 = vld [vmem:[%s509_s3] sm:$0xff]   ;;  %355 = vmatprep.mubr.msk.bf16.mxu0 %vm399_vm0, %v398_v0  ;;  %v382_v2 = vld [vmem:[%s509_s3 + $0x8] sm:$0xff]   ;;  %v383_v3 = vld [vmem:[%s509_s3 + $0x10] sm:$0xff]  }
   0x2   :  { %359 = vmatprep.subr.bf16.mxu1 %v398_v0  ;;  %375 = vmatprep.mubr.msk.bf16.mxu1 %vm399_vm0, %v398_v0  ;;  %v390_v4 = vld [vmem:[%s510_s5] sm:$0xff]   ;;  %v384_v5 = vld [vmem:[%s509_s3 + $0x18] sm:$0xff]   ;;  %v391_v6 = vld [vmem:[%s510_s5 + $0x8] sm:$0xff]  }
   0x3   :  { %340 = vmatpush3.bf16.msra.mxu0 %v381_v1  ;;  %360 = vmatpush3.bf16.msra.mxu1 %v390_v4  ;;  %v385_v7 = vld [vmem:[%s509_s3 + $0x20] sm:$0xff]   ;;  %v392_v8 = vld [vmem:[%s510_s5 + $0x10] sm:$0xff]   ;;  %v386_v9 = vld [vmem:[%s509_s3 + $0x28] sm:$0xff]  }
   0x4   :  { %341 = vmatprep.subr.bf16.mxu0 %v398_v0  ;;  %361 = vmatprep.subr.bf16.mxu1 %v398_v0  ;;  %v393_v10 = vld [vmem:[%s510_s5 + $0x18] sm:$0xff]   ;;  %v387_v11 = vld [vmem:[%s509_s3 + $0x30] sm:$0xff]   ;;  %v394_v12 = vld [vmem:[%s510_s5 + $0x20] sm:$0xff]  }
   0x5   :  { %v388_v13 = vld [vmem:[%s509_s3 + $0x38] sm:$0xff]   ;;  %v395_v14 = vld [vmem:[%s510_s5 + $0x28] sm:$0xff]   ;;  %v389_v15 = vld [vmem:[%s511_s0] sm:$0xff]  }
   0x6   :  { %v396_v16 = vld [vmem:[%s510_s5 + $0x30] sm:$0xff]   ;;  %v397_v17 = vld [vmem:[%s510_s5 + $0x38] sm:$0xff]   ;;  %v294_v18 = vld [vmem:[%s512_s4] ss:$0 sm:$0xff] }
   0x7   :  { %342 = vmatpush3.bf16.msra.mxu0 %v382_v2  ;;  %362 = vmatpush3.bf16.msra.mxu1 %v391_v6  ;;  %v304_v28 = vld [vmem:[%s513_s6] ss:$0 sm:$0xff] }
   0x8   :  { %343 = vmatprep.subr.bf16.mxu0 %v398_v0  ;;  %363 = vmatprep.subr.bf16.mxu1 %v398_v0  ;;  %v318_v29 = vld [vmem:[%s514_s2] sm:$0xff]  }
   0x9   :  { %v314_v30 = vld [vmem:[%s515_s1] sm:$0xff]   ;;  %v319_v34 = vunpack.c.l.bf16 %v318_v29  ;;  %v320_v40 = vunpack.c.h.bf16 %v318_v29 }
   0xa   :  { %v315_v35 = vunpack.c.l.bf16 %v314_v30  ;;  %v316_v44 = vunpack.c.h.bf16 %v314_v30 }
   0xb   :  { %344 = vmatpush3.bf16.msra.mxu0 %v383_v3  ;;  %364 = vmatpush3.bf16.msra.mxu1 %v392_v8 }
   0xc   :  { %345 = vmatprep.subr.bf16.mxu0 %v398_v0  ;;  %365 = vmatprep.subr.bf16.mxu1 %v398_v0 }
   0xf   :  { %346 = vmatpush3.bf16.msra.mxu0 %v384_v5  ;;  %366 = vmatpush3.bf16.msra.mxu1 %v393_v10 }
  0x10   :  { %347 = vmatprep.subr.bf16.mxu0 %v398_v0  ;;  %367 = vmatprep.subr.bf16.mxu1 %v398_v0 }
  0x13   :  { %348 = vmatpush3.bf16.msra.mxu0 %v385_v7  ;;  %368 = vmatpush3.bf16.msra.mxu1 %v394_v12 }
  0x14   :  { %349 = vmatprep.subr.bf16.mxu0 %v398_v0  ;;  %369 = vmatprep.subr.bf16.mxu1 %v398_v0 }
  0x17   :  { %350 = vmatpush3.bf16.msra.mxu0 %v386_v9  ;;  %370 = vmatpush3.bf16.msra.mxu1 %v395_v14 }
  0x18   :  { %351 = vmatprep.subr.bf16.mxu0 %v398_v0  ;;  %371 = vmatprep.subr.bf16.mxu1 %v398_v0 }
  0x1b   :  { %352 = vmatpush3.bf16.msra.mxu0 %v387_v11  ;;  %372 = vmatpush3.bf16.msra.mxu1 %v396_v16 }
  0x1c   :  { %353 = vmatprep.subr.bf16.mxu0 %v398_v0  ;;  %373 = vmatprep.subr.bf16.mxu1 %v398_v0 }
  0x1f   :  { %354 = vmatpush3.bf16.msra.mxu0 %v388_v13  ;;  %374 = vmatpush3.bf16.msra.mxu1 %v397_v17 }
  0x22   :  { %356 = vmatmul.mubr.bf16.vlgmr.msra.gmra.mrb[0].mxu0 %v389_v15 }
  0xf5   :  { %v140_v19 = vpop.f32.mrb[0].mxu0 }
  0xf6   :  { %v141_v20 = vadd.f32 %v294_v18, %v140_v19  ;;  %v357_v21 = vpop.f32.mrb[1].mxu0 }
  0xf7   :  { %v143_v22 = vpop.f32.mrb[2].mxu0 }
  0xf8   :  { %v144_v23 = vadd.f32 %v294_v18, %v143_v22  ;;  %v358_v24 = vpop.f32.mrb[3].mxu0  ;;  %v147_v25 = vmax.f32 %v141_v20, 0.0 }
  0xfa   :  { %v148_v26 = vmax.f32 %v144_v23, 0.0 }
  0xfc   :  { %v149_v27 = vpack.c.bf16 %v148_v26, %v147_v25 }
  0xfe   :  { %376 = vmatmul.mubr.bf16.vlgmr.msra.gmra.mrb[0].mxu1 %v149_v27 }
 0x1d1   :  { %v255_v31 = vpop.f32.mrb[0].mxu1 }
 0x1d2   :  { %v256_v32 = vadd.f32 %v304_v28, %v255_v31  ;;  %v377_v33 = vpop.f32.mrb[1].mxu1 }
 0x1d3   :  { %v258_v36 = vpop.f32.mrb[2].mxu1 }
 0x1d4   :  { %v262_v37 = vmax.f32 %v256_v32, 0.0  ;;  %v259_v38 = vadd.f32 %v304_v28, %v258_v36  ;;  %v378_v39 = vpop.f32.mrb[3].mxu1 }
 0x1d6   :  { %v263_v41 = vmax.f32 %v259_v38, 0.0  ;;  %v278_v42 = vmul.f32 %v319_v34, %v262_v37  ;;  %v268_v43 = vmul.f32 %v315_v35, %v262_v37 }
 0x1d8   :  { %280 = vadd.xlane.f32.xlu1 %v278_v42  ;;  %270 = vadd.xlane.f32.xlu0 %v268_v43  ;;  %v279_v45 = vmul.f32 %v320_v40, %v263_v41  ;;  %v269_v46 = vmul.f32 %v316_v44, %v263_v41 }
 0x1dc   :  { %282 = vadd.xlane.f32.xlu1 %v279_v45  ;;  %272 = vadd.xlane.f32.xlu0 %v269_v46 }
 0x265   :  { %v281_v47 = vpop.xlane.xlu1 %280  ;;  %v271_v48 = vpop.xlane.xlu0 %270 }
 0x266   :  { %v285_v49 = vsel %vm284_vm1, %v271_v48, %v281_v47 }
 0x267   :  { %288 = vst.msk [vmem:[%s516_s7] sm:$0xff] %vm287_vm2, %v285_v49 }
 0x269   :  { %v283_v50 = vpop.xlane.xlu1 %282  ;;  %v273_v51 = vpop.xlane.xlu0 %272 }
 0x26a   :  { %v286_v52 = vsel %vm284_vm1, %v273_v51, %v283_v50 }
 0x26b   :  { %289 = vst.msk [vmem:[%s516_s7 + $0x8] sm:$0xff] %vm287_vm2, %v286_v52 }

</bundles_post_ra>
